<compile_context>
chip_gen: v6e
topology: v6e:2x2x1
jax: 0.10.0
libtpu: 0.0.40
codegen_flags: <defaults>
</compile_context>

<pallas_src>
import jax
import jax.numpy as jnp
from jax.experimental import pallas as pl
from jax.experimental.pallas import tpu as pltpu


def _parallel_mlp_kernel(x_ref, w1_ref, b1_ref, w2_ref, b2_ref, o_ref):
    """All M independent 2-layer MLPs in one kernel invocation.

    x:  [M, B, D_in]   w1: [M, D_in, H]   b1: [M, 1, H]
    w2: [M, H, D_out]  b2: [M, 1, D_out]  o:  [M, B, D_out]
    """
    h = jnp.einsum(
        "mbd,mdh->mbh", x_ref[...], w1_ref[...],
        preferred_element_type=jnp.float32,
    )
    h = jnp.maximum(h + b1_ref[...], 0.0)
    y = jnp.einsum(
        "mbh,mho->mbo", h, w2_ref[...],
        preferred_element_type=jnp.float32,
    )
    y = y + b2_ref[...]
    # Reference quirk: outs[0] is never written in the PyTorch forward.
    m_idx = jax.lax.broadcasted_iota(jnp.int32, y.shape, 0)
    o_ref[...] = jnp.where(m_idx == 0, 0.0, y).astype(o_ref.dtype)


def parallel_networks_forward(xs, w1, b1, w2, b2):
    """xs: [M, B, D_in]; w1: [M, D_in, H]; b1: [M, 1, H];
    w2: [M, H, D_out]; b2: [M, 1, D_out]  ->  out: [M, B, D_out].

    Weights are stored pre-transposed relative to torch (x @ W + b)."""
    M, B, _ = xs.shape
    D_out = w2.shape[-1]
    vmem = pltpu.MemorySpace.VMEM

    return pl.pallas_call(
        _parallel_mlp_kernel,
        out_shape=jax.ShapeDtypeStruct((M, B, D_out), jnp.float32),
        in_specs=[pl.BlockSpec(memory_space=vmem)] * 5,
        out_specs=pl.BlockSpec(memory_space=vmem),
    )(xs, w1, b1, w2, b2)


def reference_forward(xs, w1, b1, w2, b2):
    """Pure-JAX reference reproducing the PyTorch ParallelNetworks.forward."""
    def one(x, w1i, b1i, w2i, b2i):
        h = jnp.maximum(x @ w1i + b1i, 0.0)
        return h @ w2i + b2i

    outs = jax.vmap(one)(xs, w1, b1, w2, b2)
    # outs[0] is never written in the reference forward -> zeros.
    return outs.at[0].set(0.0)


if __name__ == "__main__":
    # Small shapes consistent with the gradient-MLP baseline.
    num_models = 4
    batch = 8          # points per model
    in_size = 16
    hidden = 32
    out_size = 1

    key = jax.random.PRNGKey(0)
    k_x, k_w1, k_b1, k_w2, k_b2 = jax.random.split(key, 5)

    xs = jax.random.normal(k_x, (num_models, batch, in_size), dtype=jnp.float32)
    w1 = jax.random.normal(k_w1, (num_models, in_size, hidden), dtype=jnp.float32) * 0.1
    b1 = jax.random.normal(k_b1, (num_models, 1, hidden), dtype=jnp.float32) * 0.1
    w2 = jax.random.normal(k_w2, (num_models, hidden, out_size), dtype=jnp.float32) * 0.1
    b2 = jax.random.normal(k_b2, (num_models, 1, out_size), dtype=jnp.float32) * 0.1

    out = parallel_networks_forward(xs, w1, b1, w2, b2)
    out = jax.block_until_ready(out)

    ref = reference_forward(xs, w1, b1, w2, b2)
    assert out.shape == (num_models, batch, out_size)
    assert jnp.allclose(out, ref, atol=1e-5, rtol=1e-5), "mismatch vs reference"

    print("KERNEL_OK")
</pallas_src>

<mosaic_0001>
module attributes {stable_mosaic.version = 11 : i64} {
  func.func @_parallel_mlp_kernel(%arg0: memref<4x8x16xf32, #tpu.memory_space<vmem>>, %arg1: memref<4x16x32xf32, #tpu.memory_space<vmem>>, %arg2: memref<4x1x32xf32, #tpu.memory_space<vmem>>, %arg3: memref<4x32x1xf32, #tpu.memory_space<vmem>>, %arg4: memref<4x1x1xf32, #tpu.memory_space<vmem>>, %arg5: memref<4x8x1xf32, #tpu.memory_space<vmem>>) attributes {dimension_semantics = [], scalar_prefetch = 0 : i64, scratch_operands = 0 : i64, tpu.core_type = #tpu.core_type<tc>} {
    %c0 = arith.constant 0 : index
    %c0_0 = arith.constant 0 : index
    %c0_1 = arith.constant 0 : index
    %0 = vector.load %arg0[%c0, %c0_0, %c0_1] : memref<4x8x16xf32, #tpu.memory_space<vmem>>, vector<4x8x16xf32>
    %c0_2 = arith.constant 0 : index
    %c0_3 = arith.constant 0 : index
    %c0_4 = arith.constant 0 : index
    %1 = vector.load %arg1[%c0_2, %c0_3, %c0_4] : memref<4x16x32xf32, #tpu.memory_space<vmem>>, vector<4x16x32xf32>
    "tpu.trace_start"() <{level = 10 : i32, message = "mbd,mdh->mbh"}> : () -> ()
    %cst = arith.constant dense<0.000000e+00> : vector<4x8x32xf32>
    %2 = tpu.matmul %0, %1, %cst {dimension_numbers = #tpu.dot_dimension_numbers<[2], [1], [1], [2], [0, 0, 0, 1, 1, 2], [0], [0]>} : vector<4x8x16xf32>, vector<4x16x32xf32>, vector<4x8x32xf32> -> vector<4x8x32xf32>
    "tpu.trace_stop"() : () -> ()
    %c0_5 = arith.constant 0 : index
    %c0_6 = arith.constant 0 : index
    %c0_7 = arith.constant 0 : index
    %3 = vector.load %arg2[%c0_5, %c0_6, %c0_7] : memref<4x1x32xf32, #tpu.memory_space<vmem>>, vector<4x1x32xf32>
    %4 = vector.broadcast %3 : vector<4x1x32xf32> to vector<4x8x32xf32>
    %5 = arith.addf %2, %4 : vector<4x8x32xf32>
    %cst_8 = arith.constant 0.000000e+00 : f32
    %6 = vector.broadcast %cst_8 : f32 to vector<4x8x32xf32>
    %7 = arith.maximumf %5, %6 : vector<4x8x32xf32>
    %c0_9 = arith.constant 0 : index
    %c0_10 = arith.constant 0 : index
    %c0_11 = arith.constant 0 : index
    %8 = vector.load %arg3[%c0_9, %c0_10, %c0_11] : memref<4x32x1xf32, #tpu.memory_space<vmem>>, vector<4x32x1xf32>
    "tpu.trace_start"() <{level = 10 : i32, message = "mbh,mho->mbo"}> : () -> ()
    %cst_12 = arith.constant dense<0.000000e+00> : vector<4x8x1xf32>
    %9 = tpu.matmul %7, %8, %cst_12 {dimension_numbers = #tpu.dot_dimension_numbers<[2], [1], [1], [2], [0, 0, 0, 1, 1, 2], [0], [0]>} : vector<4x8x32xf32>, vector<4x32x1xf32>, vector<4x8x1xf32> -> vector<4x8x1xf32>
    "tpu.trace_stop"() : () -> ()
    %c0_13 = arith.constant 0 : index
    %c0_14 = arith.constant 0 : index
    %c0_15 = arith.constant 0 : index
    %10 = vector.load %arg4[%c0_13, %c0_14, %c0_15] : memref<4x1x1xf32, #tpu.memory_space<vmem>>, vector<4x1x1xf32>
    %11 = vector.broadcast %10 : vector<4x1x1xf32> to vector<4x8x1xf32>
    %12 = arith.addf %9, %11 : vector<4x8x1xf32>
    %13 = tpu.iota {dimensions = array<i32: 0>} : vector<4x8x1xi32>
    %c0_i32 = arith.constant 0 : i32
    %14 = vector.broadcast %c0_i32 : i32 to vector<4x8x1xi32>
    %15 = arith.cmpi eq, %13, %14 : vector<4x8x1xi32>
    %cst_16 = arith.constant 0.000000e+00 : f32
    %16 = vector.broadcast %cst_16 : f32 to vector<4x8x1xf32>
    %17 = arith.select %15, %16, %12 : vector<4x8x1xi1>, vector<4x8x1xf32>
    %c0_17 = arith.constant 0 : index
    %c0_18 = arith.constant 0 : index
    %c0_19 = arith.constant 0 : index
    %18 = vector.load %arg5[%c0_17, %c0_18, %c0_19] : memref<4x8x1xf32, #tpu.memory_space<vmem>>, vector<4x8x1xf32>
    tpu.vector_store %arg5[%c0_17, %c0_18, %c0_19], %17 {strides = array<i32>} : memref<4x8x1xf32, #tpu.memory_space<vmem>>, vector<4x8x1xf32>,
    return
  }
}

</mosaic_0001>

<bundles_post_ra>
// kernel: tpu_custom_call.1
= control target key start
LH: loop header
LB: loop body
LE: loop exit
PB: predicated region body
PF: predicated region fallthrough
CT: control target
= control target key end

     0   :  { %v829_v0 = vmov 0.0   ;;  %vm60_vm0 = vcmask 130048   ;;  %vm830_vm1 = vmmov 0   ;;  %vm401_vm2 = vcmask 261120   ;;  %s1031_s1 = inlined_call_operand.vmem [shape: f32[4,16,32], index: 1, kind: input, shape index: {}]   ;;  %s1032_s0 = inlined_call_operand.vmem [shape: f32[4,8,16], index: 0, kind: input, shape index: {}]   ;;  %s1033_s3 = inlined_call_operand.vmem [shape: f32[4,32,1], index: 3, kind: input, shape index: {}]   ;;  %s1034_s2 = inlined_call_operand.vmem [shape: f32[4,1,32], index: 2, kind: input, shape index: {}]   ;;  %s1035_s5 = inlined_call_operand.vmem [shape: f32[4,8,1], index: 5, kind: output, shape index: {}]   ;;  %s1036_s4 = inlined_call_operand.vmem [shape: f32[4,1,1], index: 4, kind: input, shape index: {}]  }
   0x1   :  { %755 = vmatprep.subr.mxu0 %v829_v0  ;;  %762 = vmatprep.subr.mxu1 %v829_v0  ;;  %v25_v1 = vld [vmem:[%s1031_s1 + $0x8] sm:$0xff]  ;;  %v27_v2 = vld [vmem:[%s1031_s1 + $0x18] sm:$0xff]  ;;  %v24_v3 = vld [vmem:[%s1031_s1] sm:$0xff]  ;;  %vm698_vm3 = vcmask 7168  }
   0x2   :  { %756 = vmatpush3.msra.mxu0 %v25_v1  ;;  %763 = vmatpush3.msra.mxu1 %v27_v2  ;;  %v26_v4 = vld [vmem:[%s1031_s1 + $0x10] sm:$0xff]  ;;  %v20_v5 = vld [vmem:[%s1032_s0] sm:$0xff]  ;;  %v21_v6 = vld [vmem:[%s1032_s0 + $0x8] sm:$0xff]  ;;  %699 = vst.msk [vmem:[%s1035_s5] sm:$0xff] %vm698_vm3, %v829_v0 }
   0x3   :  { %757 = vmatprep.subr.mxu0 %v829_v0  ;;  %764 = vmatprep.subr.mxu1 %v829_v0  ;;  %v29_v7 = vld [vmem:[%s1031_s1 + $0x28] sm:$0xff]  ;;  %v31_v8 = vld [vmem:[%s1031_s1 + $0x38] sm:$0xff]  ;;  %v28_v9 = vld [vmem:[%s1031_s1 + $0x20] sm:$0xff] }
   0x4   :  { %758 = vmatpush3.msra.mxu0 %v24_v3  ;;  %759 = vmatprep.mubr.msk.f32.mxu0 %vm830_vm1, %v829_v0  ;;  %v30_v10 = vld [vmem:[%s1031_s1 + $0x30] sm:$0xff]  ;;  %v23_v12 = vld [vmem:[%s1032_s0 + $0x18] sm:$0xff]  ;;  %v358_v17 = vld [vmem:[%s1033_s3 + $0x8] sm:$0xff] }
   0x5   :  { %765 = vmatpush3.msra.mxu1 %v26_v4  ;;  %766 = vmatprep.mubr.msk.f32.mxu1 %vm830_vm1, %v829_v0  ;;  %v22_v11 = vld [vmem:[%s1032_s0 + $0x10] sm:$0xff]  ;;  %v360_v13 = vld [vmem:[%s1033_s3 + $0x18] sm:$0xff]  ;;  %v362_v18 = vld [vmem:[%s1033_s3 + $0x28] sm:$0xff] }
   0x6   :  { %760 = vmatmul.mubr.msk.f32.vlgmr.msra.gmra.mxu0 %vm60_vm0, %v20_v5  ;;  %767 = vmatmul.mubr.msk.f32.vlgmr.msra.gmra.mxu1 %vm60_vm0, %v21_v6  ;;  %v364_v14 = vld [vmem:[%s1033_s3 + $0x38] sm:$0xff]  ;;  %v359_v15 = vld [vmem:[%s1033_s3 + $0x10] sm:$0xff]  ;;  %v357_v19 = vld [vmem:[%s1033_s3] sm:$0xff] }
   0x7   :  { %769 = vmatprep.subr.mxu0 %v829_v0  ;;  %776 = vmatprep.subr.mxu1 %v829_v0  ;;  %v363_v16 = vld [vmem:[%s1033_s3 + $0x30] sm:$0xff]  ;;  %v361_v20 = vld [vmem:[%s1033_s3 + $0x20] sm:$0xff]  ;;  %v368_v31 = vld [vmem:[%s1033_s3 + $0x58] sm:$0xff] }
   0x8   :  { %770 = vmatpush3.msra.mxu0 %v29_v7  ;;  %777 = vmatpush3.msra.mxu1 %v31_v8  ;;  %v707_v21 = vld [vmem:[%s1034_s2] ss:$0 sm:$0xff]  ;;  %v708_v22 = vld [vmem:[%s1034_s2 + $0x1] ss:$0 sm:$0xff]  ;;  %v372_v32 = vld [vmem:[%s1033_s3 + $0x78] sm:$0xff] }
   0x9   :  { %771 = vmatprep.subr.mxu0 %v829_v0  ;;  %778 = vmatprep.subr.mxu1 %v829_v0  ;;  %v709_v33 = vld [vmem:[%s1034_s2 + $0x2] ss:$0 sm:$0xff]  ;;  %v710_v34 = vld [vmem:[%s1034_s2 + $0x3] ss:$0 sm:$0xff]  ;;  %v367_v35 = vld [vmem:[%s1033_s3 + $0x50] sm:$0xff] }
   0xa   :  { %772 = vmatpush3.msra.mxu0 %v28_v9  ;;  %773 = vmatprep.mubr.msk.f32.mxu0 %vm830_vm1, %v829_v0  ;;  %v371_v36 = vld [vmem:[%s1033_s3 + $0x70] sm:$0xff]  ;;  %v366_v41 = vld [vmem:[%s1033_s3 + $0x48] sm:$0xff]  ;;  %v365_v45 = vld [vmem:[%s1033_s3 + $0x40] sm:$0xff] }
   0xb   :  { %779 = vmatpush3.msra.mxu1 %v30_v10  ;;  %780 = vmatprep.mubr.msk.f32.mxu1 %vm830_vm1, %v829_v0  ;;  %v370_v42 = vld [vmem:[%s1033_s3 + $0x68] sm:$0xff]  ;;  %v369_v48 = vld [vmem:[%s1033_s3 + $0x60] sm:$0xff] }
   0xc   :  { %774 = vmatmul.mubr.msk.f32.vlgmr.msra.gmra.mxu0 %vm60_vm0, %v22_v11  ;;  %781 = vmatmul.mubr.msk.f32.vlgmr.msra.gmra.mxu1 %vm60_vm0, %v23_v12  ;;  %v716_v49 = vld [vmem:[%s1036_s4 + $0x1] ss:$0 sm:$0xff]  ;;  %v717_v55 = vld [vmem:[%s1036_s4 + $0x2] ss:$0 sm:$0xff]  ;;  %v718_v56 = vld [vmem:[%s1036_s4 + $0x3] ss:$0 sm:$0xff] }
   0xd   :  { %783 = vmatprep.subr.mxu0 %v829_v0  ;;  %794 = vmatprep.subr.mxu1 %v829_v0 }
   0xe   :  { %784 = vmatpush3.msra.mxu0 %v360_v13  ;;  %795 = vmatpush3.msra.mxu1 %v364_v14 }
   0xf   :  { %785 = vmatprep.subr.mxu0 %v829_v0  ;;  %796 = vmatprep.subr.mxu1 %v829_v0 }
  0x10   :  { %786 = vmatpush3.msra.mxu0 %v359_v15  ;;  %797 = vmatpush3.msra.mxu1 %v363_v16 }
  0x11   :  { %787 = vmatprep.subr.mxu0 %v829_v0  ;;  %798 = vmatprep.subr.mxu1 %v829_v0 }
  0x12   :  { %791 = vmatprep.mubr.msk.f32.mxu0 %vm830_vm1, %v829_v0  ;;  %802 = vmatprep.mubr.msk.f32.mxu1 %vm830_vm1, %v829_v0 }
  0x13   :  { %788 = vmatpush3.msra.mxu0 %v358_v17  ;;  %799 = vmatpush3.msra.mxu1 %v362_v18 }
  0x14   :  { %789 = vmatprep.subr.mxu0 %v829_v0  ;;  %800 = vmatprep.subr.mxu1 %v829_v0 }
  0x15   :  { %790 = vmatpush3.msra.mxu0 %v357_v19  ;;  %801 = vmatpush3.msra.mxu1 %v361_v20 }
  0x16   :  { %805 = vmatprep.subr.mxu0 %v829_v0  ;;  %816 = vmatprep.subr.mxu1 %v829_v0 }
  0xc6   :  { %v130_v23 = vpop.f32.mrf.mxu0  ;;  %v203_v24 = vpop.f32.mrf.mxu1 }
  0xc7   :  { %v131_v25 = vadd.f32 %v707_v21, %v130_v23  ;;  %v204_v26 = vadd.f32 %v708_v22, %v203_v24 }
  0xc8   :  { %v761_v27 = vpop.f32.mrf.mxu0  ;;  %v768_v28 = vpop.f32.mrf.mxu1 }
  0xc9   :  { %v353_v29 = vmax.f32 %v131_v25, 0.0  ;;  %v354_v30 = vmax.f32 %v204_v26, 0.0 }
  0xcb   :  { %792 = vmatmul.mubr.msk.f32.vlgmr.msra.gmra.mxu0 %vm401_vm2, %v353_v29  ;;  %803 = vmatmul.mubr.msk.f32.vlgmr.msra.gmra.mxu1 %vm401_vm2, %v354_v30 }
  0xcc   :  { %v276_v37 = vpop.f32.mrf.mxu0  ;;  %v349_v38 = vpop.f32.mrf.mxu1  ;;  %806 = vmatpush3.msra.mxu0 %v368_v31  ;;  %817 = vmatpush3.msra.mxu1 %v372_v32 }
  0xcd   :  { %v277_v39 = vadd.f32 %v709_v33, %v276_v37  ;;  %v350_v40 = vadd.f32 %v710_v34, %v349_v38  ;;  %807 = vmatprep.subr.mxu0 %v829_v0  ;;  %818 = vmatprep.subr.mxu1 %v829_v0 }
  0xce   :  { %v775_v43 = vpop.f32.mrf.mxu0  ;;  %v782_v44 = vpop.f32.mrf.mxu1  ;;  %808 = vmatpush3.msra.mxu0 %v367_v35  ;;  %819 = vmatpush3.msra.mxu1 %v371_v36 }
  0xcf   :  { %809 = vmatprep.subr.mxu0 %v829_v0  ;;  %820 = vmatprep.subr.mxu1 %v829_v0  ;;  %v355_v46 = vmax.f32 %v277_v39, 0.0  ;;  %v356_v47 = vmax.f32 %v350_v40, 0.0 }
  0xd0   :  { %810 = vmatpush3.msra.mxu0 %v366_v41  ;;  %821 = vmatpush3.msra.mxu1 %v370_v42 }
  0xd1   :  { %811 = vmatprep.subr.mxu0 %v829_v0  ;;  %822 = vmatprep.subr.mxu1 %v829_v0 }
  0xd2   :  { %812 = vmatpush3.msra.mxu0 %v365_v45  ;;  %813 = vmatprep.mubr.msk.f32.mxu0 %vm830_vm1, %v829_v0 }
  0xd3   :  { %823 = vmatpush3.msra.mxu1 %v369_v48  ;;  %824 = vmatprep.mubr.msk.f32.mxu1 %vm830_vm1, %v829_v0 }
  0xd4   :  { %814 = vmatmul.mubr.msk.f32.vlgmr.msra.gmra.mxu0 %vm401_vm2, %v355_v46  ;;  %825 = vmatmul.mubr.msk.f32.vlgmr.msra.gmra.mxu1 %vm401_vm2, %v356_v47 }
 0x18b   :  { %v471_v50 = vpop.f32.mrf.mxu0  ;;  %v544_v51 = vpop.f32.mrf.mxu1 }
 0x18c   :  { %v545_v52 = vadd.f32 %v716_v49, %v544_v51 }
 0x18d   :  { %v793_v53 = vpop.f32.mrf.mxu0  ;;  %v804_v54 = vpop.f32.mrf.mxu1 }
 0x18e   :  { %700 = vst.msk [vmem:[%s1035_s5 + $0x8] sm:$0xff] %vm698_vm3, %v545_v52 }
 0x194   :  { %v617_v57 = vpop.f32.mrf.mxu0  ;;  %v690_v58 = vpop.f32.mrf.mxu1 }
 0x195   :  { %v618_v59 = vadd.f32 %v717_v55, %v617_v57  ;;  %v691_v60 = vadd.f32 %v718_v56, %v690_v58 }
 0x196   :  { %v815_v61 = vpop.f32.mrf.mxu0  ;;  %v826_v62 = vpop.f32.mrf.mxu1 }
 0x197   :  { %701 = vst.msk [vmem:[%s1035_s5 + $0x10] sm:$0xff] %vm698_vm3, %v618_v59  ;;  %702 = vst.msk [vmem:[%s1035_s5 + $0x18] sm:$0xff] %vm698_vm3, %v691_v60 }

</bundles_post_ra>
